<compile_context>
chip_gen: v7x
topology: tpu7x:2x2x1
jax: 0.10.0
libtpu: 0.0.40
codegen_flags: <defaults>
</compile_context>

<pallas_src>
import numpy as np
import jax
import jax.numpy as jnp
from jax import lax
from jax.experimental import pallas as pl
from jax.experimental.pallas import tpu as pltpu

KSIZE = 3
BN_EPS = 1e-5
LANE = 128


def _pack_params(wdw_oihw, wpw_oihw, scale1, bias1, scale2, bias2, W, CP):
    """Build lane-packed, BN-folded, bf16 MXU operands (numpy, once, outside the kernel).

    Lane layouts:
      input / depthwise lanes : l_in  = w * CP   + c   (c < Cin real, rest zero padding)
      output lanes            : l_out = w * Cout + co
    """
    wdw = np.asarray(wdw_oihw, np.float32)[:, 0, :, :]      # (Cin, 3, 3)
    wpw = np.asarray(wpw_oihw, np.float32)[:, :, 0, 0]      # (Cout, Cin)
    s1 = np.asarray(scale1, np.float32)
    b1 = np.asarray(bias1, np.float32)
    s2 = np.asarray(scale2, np.float32)
    b2 = np.asarray(bias2, np.float32)
    Cin, Cout = wdw.shape[0], wpw.shape[0]
    LIN, LOUT = W * CP, W * Cout

    # Per-kh banded lane-space depthwise matrices (W-shift, per-channel weight with BN1
    # scale folded, W-edge zeroing), stacked along K so the kernel does ONE K=3*LIN matmul
    # against X_cat = [x(h-1) | x(h) | x(h+1)].
    A = np.zeros((KSIZE, LIN, LIN), np.float32)
    for kh in range(KSIZE):
        for kw in range(KSIZE):
            for w in range(W):
                wi = w + kw - 1
                if 0 <= wi < W:
                    for c in range(Cin):
                        A[kh, wi * CP + c, w * CP + c] = wdw[c, kh, kw] * s1[c]
    A_cat = A.reshape(KSIZE * LIN, LIN)

    b1_lane = np.zeros((1, LIN), np.float32)
    for w in range(W):
        b1_lane[0, w * CP: w * CP + Cin] = b1

    # Block-diagonal pointwise matrix with BN2 scale and the first Hardswish's 1/6 folded.
    P = np.zeros((LIN, LOUT), np.float32)
    for w in range(W):
        P[w * CP: w * CP + Cin, w * Cout: (w + 1) * Cout] = wpw.T * (s2 / 6.0)[None, :]

    b2_lane = np.tile(b2, W)[None, :].astype(np.float32)     # (1, LOUT)

    return (jnp.asarray(A_cat, jnp.bfloat16), jnp.asarray(b1_lane, jnp.float32),
            jnp.asarray(P, jnp.bfloat16), jnp.asarray(b2_lane, jnp.float32))


def depth_separable_conv2d(x_nchw, wdw_oihw, wpw_oihw, scale1, bias1, scale2, bias2):
    """x_nchw: (N, Cin, H, W) f32 -> (N, Cout, H, W) f32 (inference-mode BN folded)."""
    N, Cin, H, W = x_nchw.shape
    Cout = wpw_oihw.shape[0]

    # Lane-dense packing requirements: make the perf cliff explicit instead of silent.
    assert LANE % W == 0 and LANE // W >= Cin, (
        "lane packing needs 128 % W == 0 and 128 // W >= Cin (else masked partial stores)")
    assert (W * Cout) % LANE == 0, "output lane width must be a multiple of 128"
    assert H % 8 == 0, "per-image row block must be sublane (8) aligned"

    CP = LANE // W
    LIN, LOUT = W * CP, W * Cout

    A_cat, b1_lane, P, b2_lane = _pack_params(
        wdw_oihw, wpw_oihw, scale1, bias1, scale2, bias2, W, CP)

    # Glue: NCHW -> lane-packed rows (N*H, W*CP).
    # TODO(synk): keep NHWC end-to-end in a real pipeline to kill these relayout ops.
    x_nhwc = jnp.transpose(x_nchw, (0, 2, 3, 1))
    if CP > Cin:
        x_nhwc = jnp.pad(x_nhwc, ((0, 0), (0, 0), (0, 0), (0, CP - Cin)))
    x2d = x_nhwc.reshape(N * H, LIN)

    def kernel(x_ref, a_ref, b1_ref, p_ref, b2_ref, out_ref):
        x = x_ref[...]                                          # (H, LIN) f32, one image
        row = lax.broadcasted_iota(jnp.int32, (H, LIN), 0)
        # H-halo via XLU sublane roll + boundary-row mask (no scratch, no unaligned copies).
        x_up = jnp.where(row == 0, 0.0, pltpu.roll(x, 1, axis=0))          # x[h-1]
        x_dn = jnp.where(row == H - 1, 0.0, pltpu.roll(x, H - 1, axis=0))  # x[h+1]
        x_cat = jnp.concatenate([x_up, x, x_dn], axis=1).astype(jnp.bfloat16)  # (H, 3*LIN)

        # Depthwise 3x3 + BN1 scale: one fused K=3*LIN bf16 matmul, f32 accumulation.
        acc = jnp.dot(x_cat, a_ref[...], preferred_element_type=jnp.float32)

        # BN1 bias + Hardswish (its 1/6 is folded into P); VPU math stays f32.
        y = acc + b1_ref[...]
        t = (y * jnp.clip(y + 3.0, 0.0, 6.0)).astype(jnp.bfloat16)

        # Pointwise 1x1 + BN2 scale (block-diagonal bf16 matmul), then bias + Hardswish.
        z = jnp.dot(t, p_ref[...], preferred_element_type=jnp.float32) + b2_ref[...]
        out_ref[...] = z * jnp.clip(z + 3.0, 0.0, 6.0) * (1.0 / 6.0)

    flops = N * H * (2 * (KSIZE * LIN) * LIN + 2 * LIN * LOUT)
    bytes_acc = (4 * N * H * (LIN + LOUT)                       # activations in/out (f32)
                 + 2 * (KSIZE * LIN * LIN + LIN * LOUT)         # bf16 weights
                 + 4 * (LIN + LOUT))                            # f32 biases

    out2d = pl.pallas_call(
        kernel,
        out_shape=jax.ShapeDtypeStruct((N * H, LOUT), jnp.float32),
        grid=(N,),
        in_specs=[
            pl.BlockSpec((H, LIN), lambda n: (n, 0)),                 # one image per step
            pl.BlockSpec((KSIZE * LIN, LIN), lambda n: (0, 0)),       # resident weights
            pl.BlockSpec((1, LIN), lambda n: (0, 0)),
            pl.BlockSpec((LIN, LOUT), lambda n: (0, 0)),
            pl.BlockSpec((1, LOUT), lambda n: (0, 0)),
        ],
        out_specs=pl.BlockSpec((H, LOUT), lambda n: (n, 0)),
        compiler_params=pltpu.CompilerParams(
            dimension_semantics=("parallel",)),
        cost_estimate=pl.CostEstimate(
            flops=flops, transcendentals=0, bytes_accessed=bytes_acc),
    )(x2d, A_cat, b1_lane, P, b2_lane)

    out_nhwc = out2d.reshape(N, H, W, Cout)
    return jnp.transpose(out_nhwc, (0, 3, 1, 2))


def reference_forward(x_nchw, wdw_oihw, scale1, bias1, wpw_oihw, scale2, bias2):
    """Pure-JAX reference (lax conv) mirroring the PyTorch forward (eval-mode BN)."""
    Cin = x_nchw.shape[1]
    dw = lax.conv_general_dilated(
        x_nchw, wdw_oihw, window_strides=(1, 1),
        padding=((1, 1), (1, 1)), feature_group_count=Cin,
        dimension_numbers=("NCHW", "OIHW", "NCHW"))
    y = dw * scale1[None, :, None, None] + bias1[None, :, None, None]
    y = y * jnp.clip(y + 3.0, 0.0, 6.0) / 6.0
    pw = lax.conv_general_dilated(
        y, wpw_oihw, window_strides=(1, 1), padding=((0, 0), (0, 0)),
        dimension_numbers=("NCHW", "OIHW", "NCHW"))
    z = pw * scale2[None, :, None, None] + bias2[None, :, None, None]
    z = z * jnp.clip(z + 3.0, 0.0, 6.0) / 6.0
    return z


if __name__ == "__main__":
    N, Cin, Cout, H, W = 2, 4, 8, 16, 16

    key = jax.random.PRNGKey(0)
    keys = jax.random.split(key, 10)

    x = jax.random.normal(keys[0], (N, Cin, H, W), dtype=jnp.float32)

    # Depthwise conv weight: torch shape (Cin, 1, 3, 3)  (groups = Cin)
    wdw_oihw = 0.1 * jax.random.normal(keys[1], (Cin, 1, KSIZE, KSIZE), jnp.float32)
    # Pointwise conv weight: torch shape (Cout, Cin, 1, 1)
    wpw_oihw = 0.1 * jax.random.normal(keys[2], (Cout, Cin, 1, 1), jnp.float32)

    # BatchNorm params (deterministic, inference-mode folding).
    g1 = 1.0 + 0.1 * jax.random.normal(keys[3], (Cin,), jnp.float32)
    be1 = 0.1 * jax.random.normal(keys[4], (Cin,), jnp.float32)
    rm1 = 0.1 * jax.random.normal(keys[5], (Cin,), jnp.float32)
    rv1 = jnp.abs(1.0 + 0.1 * jax.random.normal(keys[6], (Cin,), jnp.float32))
    g2 = 1.0 + 0.1 * jax.random.normal(keys[7], (Cout,), jnp.float32)
    be2 = 0.1 * jax.random.normal(keys[8], (Cout,), jnp.float32)
    rm2 = 0.1 * jax.random.normal(keys[9], (Cout,), jnp.float32)
    rv2 = jnp.abs(1.0 + 0.05 * rm2)

    scale1 = g1 / jnp.sqrt(rv1 + BN_EPS)
    bias1 = be1 - rm1 * scale1
    scale2 = g2 / jnp.sqrt(rv2 + BN_EPS)
    bias2 = be2 - rm2 * scale2

    out = depth_separable_conv2d(x, wdw_oihw, wpw_oihw, scale1, bias1, scale2, bias2)
    out = jax.block_until_ready(out)

    ref = reference_forward(x, wdw_oihw, scale1, bias1, wpw_oihw, scale2, bias2)
    # bf16 MXU operands with f32 accumulation: loosened tolerance per review.
    np.testing.assert_allclose(np.asarray(out), np.asarray(ref), rtol=2e-2, atol=3e-3)

    print("KERNEL_OK")
</pallas_src>

<mosaic_0001>
module attributes {stable_mosaic.version = 11 : i64} {
  func.func @kernel(%arg0: i32, %arg1: memref<16x128xf32, #tpu.memory_space<vmem>>, %arg2: memref<384x128xbf16, #tpu.memory_space<vmem>>, %arg3: memref<1x128xf32, #tpu.memory_space<vmem>>, %arg4: memref<128x128xbf16, #tpu.memory_space<vmem>>, %arg5: memref<1x128xf32, #tpu.memory_space<vmem>>, %arg6: memref<16x128xf32, #tpu.memory_space<vmem>>) attributes {dimension_semantics = [#tpu.dimension_semantics<parallel>], iteration_bounds = array<i64: 2>, scalar_prefetch = 0 : i64, scratch_operands = 0 : i64, tpu.core_type = #tpu.core_type<tc>, window_params = [{transform_indices = @transform_0, window_bounds = array<i64: 16, 128>}, {pipeline_mode = #tpu.pipeline_mode<synchronous>, transform_indices = @transform_1, window_bounds = array<i64: 384, 128>}, {pipeline_mode = #tpu.pipeline_mode<synchronous>, transform_indices = @transform_2, window_bounds = array<i64: 1, 128>}, {pipeline_mode = #tpu.pipeline_mode<synchronous>, transform_indices = @transform_3, window_bounds = array<i64: 128, 128>}, {pipeline_mode = #tpu.pipeline_mode<synchronous>, transform_indices = @transform_4, window_bounds = array<i64: 1, 128>}, {transform_indices = @transform_5, window_bounds = array<i64: 16, 128>}]} {
    %c0 = arith.constant 0 : index
    %c0_0 = arith.constant 0 : index
    %0 = vector.load %arg1[%c0, %c0_0] : memref<16x128xf32, #tpu.memory_space<vmem>>, vector<16x128xf32>
    %1 = tpu.iota {dimensions = array<i32: 0>} : vector<16x128xi32>
    %c0_i32 = arith.constant 0 : i32
    %2 = vector.broadcast %c0_i32 : i32 to vector<16x128xi32>
    %3 = arith.cmpi eq, %1, %2 : vector<16x128xi32>
    %c1_i32 = arith.constant 1 : i32
    %4 = tpu.dynamic_rotate %0 by %c1_i32 dim 0 : vector<16x128xf32>, i32 -> vector<16x128xf32>
    %cst = arith.constant 0.000000e+00 : f32
    %5 = vector.broadcast %cst : f32 to vector<16x128xf32>
    %6 = arith.select %3, %5, %4 : vector<16x128xi1>, vector<16x128xf32>
    %c15_i32 = arith.constant 15 : i32
    %7 = vector.broadcast %c15_i32 : i32 to vector<16x128xi32>
    %8 = arith.cmpi eq, %1, %7 : vector<16x128xi32>
    %c15_i32_1 = arith.constant 15 : i32
    %9 = tpu.dynamic_rotate %0 by %c15_i32_1 dim 0 : vector<16x128xf32>, i32 -> vector<16x128xf32>
    %cst_2 = arith.constant 0.000000e+00 : f32
    %10 = vector.broadcast %cst_2 : f32 to vector<16x128xf32>
    %11 = arith.select %8, %10, %9 : vector<16x128xi1>, vector<16x128xf32>
    %12 = tpu.concatenate %6, %0, %11 in 1 : vector<16x128xf32>, vector<16x128xf32>, vector<16x128xf32> -> vector<16x384xf32>
    %13 = arith.truncf %12 : vector<16x384xf32> to vector<16x384xbf16>
    %c0_3 = arith.constant 0 : index
    %c0_4 = arith.constant 0 : index
    %14 = vector.load %arg2[%c0_3, %c0_4] : memref<384x128xbf16, #tpu.memory_space<vmem>>, vector<384x128xbf16>
    %cst_5 = arith.constant dense<0.000000e+00> : vector<16x128xf32>
    %15 = tpu.matmul %13, %14, %cst_5 {dimension_numbers = #tpu.dot_dimension_numbers<[1], [0], [0], [1], [0, 0, 1, 1], [], []>} : vector<16x384xbf16>, vector<384x128xbf16>, vector<16x128xf32> -> vector<16x128xf32>
    %c0_6 = arith.constant 0 : index
    %c0_7 = arith.constant 0 : index
    %16 = vector.load %arg3[%c0_6, %c0_7] : memref<1x128xf32, #tpu.memory_space<vmem>>, vector<1x128xf32>
    %17 = vector.broadcast %16 : vector<1x128xf32> to vector<16x128xf32>
    %18 = arith.addf %15, %17 : vector<16x128xf32>
    %cst_8 = arith.constant 3.000000e+00 : f32
    %19 = vector.broadcast %cst_8 : f32 to vector<16x128xf32>
    %20 = arith.addf %18, %19 : vector<16x128xf32>
    %cst_9 = arith.constant 0.000000e+00 : f32
    %cst_10 = arith.constant 6.000000e+00 : f32
    %21 = vector.broadcast %cst_9 : f32 to vector<16x128xf32>
    %22 = arith.maximumf %21, %20 : vector<16x128xf32>
    %23 = vector.broadcast %cst_10 : f32 to vector<16x128xf32>
    %24 = arith.minimumf %23, %22 : vector<16x128xf32>
    %25 = arith.mulf %18, %24 : vector<16x128xf32>
    %26 = arith.truncf %25 : vector<16x128xf32> to vector<16x128xbf16>
    %c0_11 = arith.constant 0 : index
    %c0_12 = arith.constant 0 : index
    %27 = vector.load %arg4[%c0_11, %c0_12] : memref<128x128xbf16, #tpu.memory_space<vmem>>, vector<128x128xbf16>
    %cst_13 = arith.constant dense<0.000000e+00> : vector<16x128xf32>
    %28 = tpu.matmul %26, %27, %cst_13 {dimension_numbers = #tpu.dot_dimension_numbers<[1], [0], [0], [1], [0, 0, 1, 1], [], []>} : vector<16x128xbf16>, vector<128x128xbf16>, vector<16x128xf32> -> vector<16x128xf32>
    %c0_14 = arith.constant 0 : index
    %c0_15 = arith.constant 0 : index
    %29 = vector.load %arg5[%c0_14, %c0_15] : memref<1x128xf32, #tpu.memory_space<vmem>>, vector<1x128xf32>
    %30 = vector.broadcast %29 : vector<1x128xf32> to vector<16x128xf32>
    %31 = arith.addf %28, %30 : vector<16x128xf32>
    %cst_16 = arith.constant 3.000000e+00 : f32
    %32 = vector.broadcast %cst_16 : f32 to vector<16x128xf32>
    %33 = arith.addf %31, %32 : vector<16x128xf32>
    %cst_17 = arith.constant 0.000000e+00 : f32
    %cst_18 = arith.constant 6.000000e+00 : f32
    %34 = vector.broadcast %cst_17 : f32 to vector<16x128xf32>
    %35 = arith.maximumf %34, %33 : vector<16x128xf32>
    %36 = vector.broadcast %cst_18 : f32 to vector<16x128xf32>
    %37 = arith.minimumf %36, %35 : vector<16x128xf32>
    %38 = arith.mulf %31, %37 : vector<16x128xf32>
    %cst_19 = arith.constant 0.166666672 : f32
    %39 = vector.broadcast %cst_19 : f32 to vector<16x128xf32>
    %40 = arith.mulf %38, %39 : vector<16x128xf32>
    %c0_20 = arith.constant 0 : index
    %c0_21 = arith.constant 0 : index
    %41 = vector.load %arg6[%c0_20, %c0_21] : memref<16x128xf32, #tpu.memory_space<vmem>>, vector<16x128xf32>
    tpu.vector_store %arg6[%c0_20, %c0_21], %40 {strides = array<i32>} : memref<16x128xf32, #tpu.memory_space<vmem>>, vector<16x128xf32>,
    return
  }
  func.func @transform_0(%arg0: i32) -> (i32, i32) {
    %c0_i32 = arith.constant 0 : i32
    %c0_i32_0 = arith.constant 0 : i32
    return %arg0, %c0_i32 : i32, i32
  }
  func.func @transform_1(%arg0: i32) -> (i32, i32) {
    %c0_i32 = arith.constant 0 : i32
    %c0_i32_0 = arith.constant 0 : i32
    %c0_i32_1 = arith.constant 0 : i32
    return %c0_i32, %c0_i32_0 : i32, i32
  }
  func.func @transform_2(%arg0: i32) -> (i32, i32) {
    %c0_i32 = arith.constant 0 : i32
    %c0_i32_0 = arith.constant 0 : i32
    %c0_i32_1 = arith.constant 0 : i32
    return %c0_i32, %c0_i32_0 : i32, i32
  }
  func.func @transform_3(%arg0: i32) -> (i32, i32) {
    %c0_i32 = arith.constant 0 : i32
    %c0_i32_0 = arith.constant 0 : i32
    %c0_i32_1 = arith.constant 0 : i32
    return %c0_i32, %c0_i32_0 : i32, i32
  }
  func.func @transform_4(%arg0: i32) -> (i32, i32) {
    %c0_i32 = arith.constant 0 : i32
    %c0_i32_0 = arith.constant 0 : i32
    %c0_i32_1 = arith.constant 0 : i32
    return %c0_i32, %c0_i32_0 : i32, i32
  }
  func.func @transform_5(%arg0: i32) -> (i32, i32) {
    %c0_i32 = arith.constant 0 : i32
    %c0_i32_0 = arith.constant 0 : i32
    return %arg0, %c0_i32 : i32, i32
  }
}

</mosaic_0001>

<bundles_post_ra>
// kernel: tpu_custom_call.1
= control target key start
LH: loop header
LB: loop body
LE: loop exit
PB: predicated region body
PF: predicated region fallthrough
CT: control target
= control target key end

     0   :  { %10 = vsyncpa [#allocation3], 0  ;;  %s1552_s0 = inlined_call_operand.hbm [shape: f32[32,128], index: 0, kind: input, shape index: {}]   ;;  %s1553_s1 = inlined_call_operand.hbm [shape: bf16[384,128], index: 1, kind: input, shape index: {}]   ;;  %s1554_s2 = inlined_call_operand.vmem [shape: f32[1,128], index: 2, kind: input, shape index: {}]   ;;  %s1555_s3 = inlined_call_operand.hbm [shape: bf16[128,128], index: 3, kind: input, shape index: {}]   ;;  %s1556_s4 = inlined_call_operand.vmem [shape: f32[1,128], index: 4, kind: input, shape index: {}]   ;;  %s1557_s5 = inlined_call_operand.hbm [shape: f32[32,128], index: 5, kind: output, shape index: {}]  }
   0x1   :  { %12 = vsyncpa [#allocation3 + $0x1], 0 }
   0x2   :  { %13 = vsyncpa [#allocation6], 0 }
   0x3   :  { %14 = vsyncpa [#allocation4], 0 }
   0x4   :  { %16 = vsyncpa [#allocation4 + $0x1], 0  ;;  %s1274_s18 = smov 0   ;;  %s1276_s19 = smov 0  }
   0x5   :  { %s1278_s20 = smov 0   ;;  %s1280_s21 = smov 0  }
   0x6 LB: > { %s1295_s22 = sadd.s32 4294967295, %s1229_s21   ;;  %s821_s23 = sadd.s32 4294967294, %s1229_s21   ;;  %s1229_s21 = sphi %s1280_s21, %s1579_s21   ;;  %s1225_s20 = sphi %s1278_s20, %s1578_s20   ;;  %s1221_s19 = sphi %s1276_s19, %s1577_s19   ;;  %s1217_s18 = sphi %s1274_s18, %s1576_s18  }
   0x7   : > { %p42_p0 = scmp.ne.s32.totalorder %s1221_s19, %s1217_s18  ;;  %p1558_p1 = scmp.eq.s32.totalorder %s1295_s22, 0 }
   0x8   : > { %p156_p3 = scmp.eq.s32.totalorder %s821_s23, 1  ;;  %p822_p5 = scmp.ge.s32.totalorder %s1229_s21, 1 }
   0x9   : > { %p1304_p4 = por %p1558_p1, %p42_p0  ;;  %p163_p7 = scmp.lt.s32.totalorder %s1229_s21, 3 }
   0xa   : > { %p1309_p6 = por %p156_p3, %p42_p0  ;;  %s1231_s27 = smov [#allocation5]  }
   0xb   : > { %s1561_s24 = scalar_select %p1304_p4, 1, 0 }
   0xc   : > { %s1562_s25 = scalar_select %p1309_p6, 1, 0 }
   0xd   : > { %p1314_p8 = pnand %p822_p5, %p163_p7  ;;  %s175_s28 = sshll.u32 %s1231_s27, 4  ;;  %s1318_s28 = int_to_ptr.vmem [resolvable:$true] %s175_s28 }
   0xe   : > { %s1232_s30 = smov [#allocation7]   ;;  %s1073_s9 = scalar_lea.hbm %s1553_s1, 3072 }
   0xf   : > { %p977_p9 = pneg %p1314_p8  ;;  %s191_s6 = sshll.u32 %s1232_s30, 4  ;;  %s1329_s6 = int_to_ptr.vmem [resolvable:$true] %s191_s6 }
  0x10   : > { %p1074_p12 = scmp.ne.s32.totalorder %s1553_s1, %s1073_s9  ;;  %p1080_p5 = scmp.lt.u32.totalorder %s1073_s9, %s1553_s1 }
  0x11   : > { %p1325_p11 = pnand %p977_p9, %p1558_p1 }
  0x13   : > { %p1075_p13 = pneg %p1325_p11 }
  0x15   : > { %p1076_p0 = pnand %p1075_p13, %p1074_p12 }
  0x17   : > { %p1077_p3 = pneg %p1076_p0 }
  0x19   : > { %p1082_p7 = pnand %p1080_p5, %p1077_p3 }
  0x1b   : > { %1085 = shalt.err (!%p1082_p7)
}
  0x1c   : > { %s1086_s14 = scalar_lea.vmem %s1318_s28, 3072  ;;  %p1094_p2 = scmp.lt.s32.totalorder %s1318_s28, %s1318_s28 }
  0x1d   : > { %p1087_p9 = scmp.ne.s32.totalorder %s1318_s28, %s1086_s14  ;;  %p1095_p12 = scmp.lt.s32.totalorder %s1086_s14, %s1086_s14 }
  0x1f   : > { %p1089_p10 = pnand %p1087_p9, %p1075_p13  ;;  %p1096_p0 = por %p1095_p12, %p1094_p2 }
  0x21   : > { %p1090_p1 = pneg %p1089_p10 }
  0x23   : > { %p1097_p6 = pnand %p1096_p0, %p1090_p1 }
  0x25   : > { %1100 = shalt.err (!%p1097_p6)
}
  0x26   : > { %s1233_s15 = smov 64   ;;  %s1234_s16 = smov 4  }
  0x27   : > { %980 = dma.hbm_to_vmem [thread:$0]  (!%p1325_p11), %s1553_s1, 3072, %s1318_s28, [#allocation6], %s1233_s15, %s1233_s15, %s1234_s16  }
  0x28   : > { %s1101_s7 = scalar_lea.hbm %s1555_s3, 1024 }
  0x29   : > { %p1102_p2 = scmp.ne.s32.totalorder %s1555_s3, %s1101_s7  ;;  %p1108_p10 = scmp.lt.u32.totalorder %s1101_s7, %s1555_s3 }
  0x2b   : > { %p1104_p1 = pnand %p1102_p2, %p1075_p13 }
  0x2d   : > { %p1105_p6 = pneg %p1104_p1 }
  0x2f   : > { %p1110_p3 = pnand %p1108_p10, %p1105_p6 }
  0x31   : > { %1113 = shalt.err (!%p1110_p3)
}
  0x32   : > { %s1114_s28 = scalar_lea.vmem %s1329_s6, 1024  ;;  %p1122_p12 = scmp.lt.s32.totalorder %s1329_s6, %s1329_s6 }
  0x33   : > { %p1115_p5 = scmp.ne.s32.totalorder %s1329_s6, %s1114_s28  ;;  %p1123_p0 = scmp.lt.s32.totalorder %s1114_s28, %s1114_s28 }
  0x35   : > { %p1117_p7 = pnand %p1115_p5, %p1075_p13  ;;  %p1124_p2 = por %p1123_p0, %p1122_p12 }
  0x37   : > { %p1118_p9 = pneg %p1117_p7 }
  0x39   : > { %p1125_p1 = pnand %p1124_p2, %p1118_p9 }
  0x3b   : > { %1128 = shalt.err (!%p1125_p1)
}
  0x3c   : > { %983 = dma.hbm_to_vmem [thread:$0]  (!%p1325_p11), %s1555_s3, 1024, %s1329_s6, [#allocation6], %s1233_s15, %s1233_s15, %s1234_s16  }
  0x3d   : > { %s1384_s14 = sadd.s32 1, %s1229_s21   ;;  %s29_s29 = sadd.s32 1, %s1225_s20 }
  0x3e   : > { %s26_s17 = ssub.s32 %s1229_s21, %s1384_s14  ;;  %p36_p13 = scmp.ne.s32.totalorder %s1225_s20, %s1221_s19 }
  0x3f   : > { %p27_p6 = scmp.eq.s32.totalorder %s26_s17, 0  ;;  %p37_p10 = scmp.eq.s32.totalorder %s1229_s21, 0 }
  0x40   : > { %p1565_p3 = scmp.eq.s32.totalorder %s1295_s22, 1  ;;  %p994_p7 = scmp.lt.s32.totalorder %s1229_s21, 2 }
  0x41   : > { %s1400_s27 = scalar_select %p27_p6, %s1225_s20, %s29_s29  }
  0x42   : > { %p1394_p5 = por %p1565_p3, %p36_p13  ;;  %p38_p9 = por %p37_p10, %p36_p13 }
  0x43   : > { %s208_s30 = sand.u32 1, %s1225_s20   ;;  %s881_s6 = sshll.u32 %s1229_s21, 8 }
  0x44   : > { %s1566_s23 = scalar_select %p1394_p5, 1, 0 }
  0x45   : > { %s826_s7 = sshll.u32 %s208_s30, 4  ;;  %s1407_s8 = scalar_lea.hbm %s1552_s0, %s881_s6 }
  0x46   : > { %s212_s9 = scalar_lea.vmem [#allocation2], %s826_s7  ;;  %p1411_p11 = pnand %p994_p7, %p38_p9 }
  0x47   : > { %s219_s10 = sshll.u32 %s212_s9, 4  ;;  %s1415_s28 = scalar_lea.sflag [#allocation3], %s208_s30  ;;  %s1409_s10 = int_to_ptr.vmem [resolvable:$true] %s219_s10 }
  0x48   : > { %s1129_s12 = scalar_lea.hbm %s1407_s8, 256  ;;  %p1131_p0 = pneg %p1411_p11 }
  0x49   : > { %p1130_p12 = scmp.ne.s32.totalorder %s1407_s8, %s1129_s12  ;;  %s1134_s17 = scalar_lea.hbm %s1552_s0, 512 }
  0x4a   : > { %p1135_p13 = scmp.lt.u32.totalorder %s1407_s8, %s1552_s0  ;;  %p1136_p6 = scmp.lt.u32.totalorder %s1134_s17, %s1129_s12 }
  0x4b   : > { %p1132_p2 = pnand %p1131_p0, %p1130_p12  ;;  %p1138_p3 = scmp.lt.u32.totalorder %s1129_s12, %s1407_s8 }
  0x4c   : > { %p1137_p10 = por %p1136_p6, %p1135_p13 }
  0x4d   : > { %p1133_p1 = pneg %p1132_p2 }
  0x4e   : > { %p1139_p7 = por %p1138_p3, %p1137_p10 }
  0x50   : > { %p1140_p9 = pnand %p1139_p7, %p1133_p1 }
  0x52   : > { %1143 = shalt.err (!%p1140_p9)
}
  0x53   : > { %s1144_s30 = scalar_lea.vmem %s1409_s10, 256  ;;  %s1235_s15 = smov [#allocation2]  }
  0x54   : > { %p1145_p12 = scmp.ne.s32.totalorder %s1409_s10, %s1144_s30  ;;  %s1149_s16 = sshll.u32 %s1235_s15, 4  ;;  %s1150_s16 = int_to_ptr.vmem [resolvable:$false] %s1149_s16 }
  0x55   : > { %s1151_s9 = scalar_lea.vmem %s1150_s16, 512  ;;  %p1152_p4 = scmp.lt.s32.totalorder %s1409_s10, %s1150_s16 }
  0x56   : > { %p1147_p2 = pnand %p1145_p12, %p1131_p0  ;;  %p1153_p13 = scmp.lt.s32.totalorder %s1151_s9, %s1144_s30 }
  0x58   : > { %p1148_p5 = pneg %p1147_p2  ;;  %p1154_p6 = por %p1153_p13, %p1152_p4 }
  0x5a   : > { %p1155_p10 = pnand %p1154_p6, %p1148_p5 }
  0x5c   : > { %1158 = shalt.err (!%p1155_p10)
}
  0x5d   : > { %s1236_s12 = smov 128   ;;  %s1237_s13 = smov 8  }
  0x5e   : > { %987 = dma.hbm_to_vmem [thread:$0]  (!%p1411_p11), %s1407_s8, 256, %s1409_s10, %s1415_s28, %s1236_s12, %s1236_s12, %s1237_s13  }
  0x5f   : > { %231 = sbr.rel (%p1314_p8) target bundleno = 612 (0x264), region = 40  ;;  %s1446_s29 = sand.u32 (!%p1314_p8), 1, %s1221_s19  }
  0x60   : > { %s830_s17 = sshll.u32 (!%p1314_p8), %s1446_s29, 4  ;;  %s234_s7 = scalar_lea.sflag (!%p1314_p8), [#allocation3], %s1446_s29 }
  0x61   : > { %s1452_s6 = scalar_lea.vmem (!%p1314_p8), [#allocation2], %s830_s17  ;;  %p1568_p4 = scmp.ne.s32.totalorder (!%p1314_p8), %s1561_s24, 0 }
  0x66   : > { %1204 = dma.done.wait (%p1568_p4), %s234_s7, 256  }
  0x67   : > { %1206 = vsyncadd (%p1568_p4), %s234_s7, 4294967040  ;;  %p1569_p5 = scmp.eq.s32.totalorder %s1295_s22, 0 }
  0x69   : > { %1208 = dma.done.wait (%p1569_p5), [#allocation6], 4096   ;;  %p1570_p8 = pmov %p1569_p5 }
  0x6a   : > { %v1238_v0 = vmov 0.0   ;;  %vm1239_vm0 = vmmov 0   ;;  %v1041_v1 = vld [vmem:[#allocation5 + $0x40] sm:$0xff]   ;;  %v1044_v4 = vld [vmem:[#allocation5 + $0x48] sm:$0xff]   ;;  %v1047_v7 = vld [vmem:[#allocation5 + $0x50] sm:$0xff]   ;;  %v277_v15 = vlaneseq  ;;  %vm1240_vm4 = vmmov 1  }
  0x6b   : > { %1210 = vsyncadd (%p1570_p8), [#allocation6], 4294963200  ;;  %925 = vmatprep.subr.bf16.mxu1 %v1238_v0  ;;  %941 = vmatprep.mubr.msk.bf16.mxu1 %vm1239_vm0, %v1238_v0  ;;  %v1042_v2 = vld [vmem:[#allocation5] sm:$0xff]   ;;  %v1045_v5 = vld [vmem:[#allocation5 + $0x8] sm:$0xff]   ;;  %s271_s11 = scalar_lea.vmem [#allocation8], %s830_s17  ;;  %s882_s30 = sshll.u32 %s1295_s22, 8 }
  0x6c   : > { %885 = vmatprep.subr.bf16.mxu0 %v1041_v1  ;;  %v1043_v3 = vld [vmem:[#allocation5 + $0x80] sm:$0xff]   ;;  %v1046_v6 = vld [vmem:[#allocation5 + $0x88] sm:$0xff]   ;;  %v1048_v8 = vld [vmem:[#allocation5 + $0x10] sm:$0xff]   ;;  %v278_v19 = vshrl.u32 %v277_v15, 7  ;;  %s729_s28 = sshll.u32 %s271_s11, 4  ;;  %s1508_s9 = scalar_lea.hbm %s1557_s5, %s882_s30  ;;  %s1503_s28 = int_to_ptr.vmem [resolvable:$true] %s729_s28 }
  0x6d   : > { %886 = vmatpush3.bf16.msra.mxu0 %v1042_v2  ;;  %926 = vmatpush3.bf16.msra.mxu1 %v1043_v3  ;;  %v1049_v9 = vld [vmem:[#allocation5 + $0x90] sm:$0xff]   ;;  %v1050_v10 = vld [vmem:[#allocation5 + $0x58] sm:$0xff]   ;;  %v1053_v13 = vld [vmem:[#allocation5 + $0x60] sm:$0xff]   ;;  %s716_s12 = scalar_lea.sflag [#allocation4], %s1446_s29  ;;  %s1159_s13 = scalar_lea.vmem %s1503_s28, 256 }
  0x6e   : > { %887 = vmatprep.subr.bf16.mxu0 %v1044_v4  ;;  %927 = vmatprep.subr.bf16.mxu1 %v1238_v0  ;;  %v1051_v11 = vld [vmem:[#allocation5 + $0x18] sm:$0xff]   ;;  %v1054_v14 = vld [vmem:[#allocation5 + $0x20] sm:$0xff]   ;;  %v1056_v17 = vld [vmem:[#allocation5 + $0x68] sm:$0xff]   ;;  %vm284_vm1 = vcmp.lt.s32.totalorder %v278_v19, 1  ;;  %vm883_vm2 = vcmp.ne.s32.totalorder %v278_v19, 0  ;;  %v279_v27 = vadd.s32 8, %v278_v19  ;;  %p1160_p11 = scmp.ne.s32.totalorder %s1503_s28, %s1159_s13 }
  0x6f   : > { %v1052_v12 = vld [vmem:[#allocation5 + $0x98] sm:$0xff]   ;;  %v1055_v16 = vld [vmem:[#allocation5 + $0xa0] sm:$0xff]   ;;  %v1057_v18 = vld [vmem:[#allocation5 + $0x28] sm:$0xff]   ;;  %vm293_vm3 = vcmp.lt.s32.totalorder %v278_v19, 7  ;;  %p1573_p0 = scmp.ne.s32.totalorder %s1566_s23, 0  ;;  %s1241_s22 = smov [#allocation8]  }
  0x70   : > { %v1058_v20 = vld [vmem:[#allocation5 + $0xa8] sm:$0xff]   ;;  %v1059_v21 = vld [vmem:[#allocation5 + $0x70] sm:$0xff]   ;;  %v1062_v24 = vld [vmem:[#allocation5 + $0x78] sm:$0xff]   ;;  %vm884_vm6 = vcmp.ne.s32.totalorder %v279_v27, 15  ;;  %s1163_s17 = sshll.u32 %s1241_s22, 4  ;;  %s1164_s17 = int_to_ptr.vmem [resolvable:$false] %s1163_s17 }
  0x71   : > { %888 = vmatpush3.bf16.msra.mxu0 %v1045_v5  ;;  %928 = vmatpush3.bf16.msra.mxu1 %v1046_v6  ;;  %v1060_v22 = vld [vmem:[#allocation5 + $0x30] sm:$0xff]   ;;  %v276_v26 = vld [vmem:[%s1452_s6 + $0x8] sm:$0xff]  ;;  %vm1474_vm5 = vmpackc.low %vm1240_vm4, %vm883_vm2  ;;  %p1161_p1 = pnand %p1160_p11, %p1573_p0  ;;  %s1165_s7 = scalar_lea.vmem %s1164_s17, 512 }
  0x72   : > { %889 = vmatprep.subr.bf16.mxu0 %v1047_v7  ;;  %929 = vmatprep.subr.bf16.mxu1 %v1238_v0  ;;  %v1061_v23 = vld [vmem:[#allocation5 + $0xb0] sm:$0xff]   ;;  %v283_v29 = vrot.slane %v276_v26, 7  ;;  %v292_v31 = vrot.slane %v276_v26, 1  ;;  %v1063_v34 = vld [vmem:[#allocation5 + $0x38] sm:$0xff]   ;;  %v1065_v42 = vld [vmem:[#allocation7] sm:$0xff]   ;;  %p1166_p7 = scmp.lt.s32.totalorder %s1503_s28, %s1164_s17  ;;  %p1167_p9 = scmp.lt.s32.totalorder %s1165_s7, %s1159_s13 }
  0x73   : > { %v275_v25 = vld [vmem:[%s1452_s6] sm:$0xff]  ;;  %v1064_v37 = vld [vmem:[#allocation5 + $0xb8] sm:$0xff]   ;;  %vm864_vm7 = vmpackc.low %vm884_vm6, %vm1240_vm4  ;;  %p1162_p3 = pneg %p1161_p1 }
  0x74   : > { %v282_v28 = vrot.slane %v275_v25, 7  ;;  %v291_v30 = vrot.slane %v275_v25, 1  ;;  %v299_v32 = vpack.c.bf16 %v276_v26, %v275_v25  ;;  %v1066_v43 = vld [vmem:[#allocation7 + $0x8] sm:$0xff]   ;;  %v1067_v44 = vld [vmem:[#allocation7 + $0x10] sm:$0xff]   ;;  %v1068_v45 = vld [vmem:[#allocation7 + $0x18] sm:$0xff]   ;;  %p1168_p12 = por %p1167_p9, %p1166_p7 }
  0x75   : > { %890 = vmatpush3.bf16.msra.mxu0 %v1048_v8  ;;  %930 = vmatpush3.bf16.msra.mxu1 %v1049_v9  ;;  %v1069_v46 = vld [vmem:[#allocation7 + $0x20] sm:$0xff]   ;;  %v1070_v47 = vld [vmem:[#allocation7 + $0x28] sm:$0xff]   ;;  %v1071_v48 = vld [vmem:[#allocation7 + $0x30] sm:$0xff]  }
  0x76   : > { %891 = vmatprep.subr.bf16.mxu0 %v1050_v10  ;;  %931 = vmatprep.subr.bf16.mxu1 %v1238_v0  ;;  %v285_v35 = vsel %vm284_vm1, %v282_v28, %v283_v29  ;;  %v286_v36 = vsel %vm284_vm1, %v283_v29, %v282_v28  ;;  %v294_v38 = vsel %vm293_vm3, %v291_v30, %v292_v31  ;;  %v1072_v49 = vld [vmem:[#allocation7 + $0x38] sm:$0xff]   ;;  %v834_v52 = vld [vmem:[%s1554_s2] ss:$0 sm:$0xff]  ;;  %p1169_p2 = pnand %p1168_p12, %p1162_p3 }
  0x77   : > { %532 = vmatprep.mubr.bf16.mxu0 %v299_v32  ;;  %v295_v39 = vsel %vm293_vm3, %v292_v31, %v291_v30  ;;  %v861_v40 = vpack.c.bf16 %v285_v35, %v286_v36  ;;  %v867_v10 = vld [vmem:[%s1556_s4] ss:$0 sm:$0xff] }
  0x78   : > { %v865_v41 = vpack.c.bf16 %v295_v39, %v294_v38 }
  0x79   : > { %892 = vmatpush3.bf16.msra.mxu0 %v1051_v11  ;;  %932 = vmatpush3.bf16.msra.mxu1 %v1052_v12 }
  0x7a   : > { %893 = vmatprep.subr.bf16.mxu0 %v1053_v13  ;;  %933 = vmatprep.subr.bf16.mxu1 %v1238_v0 }
  0x7d   : > { %894 = vmatpush3.bf16.msra.mxu0 %v1054_v14  ;;  %934 = vmatpush3.bf16.msra.mxu1 %v1055_v16 }
  0x7e   : > { %895 = vmatprep.subr.bf16.mxu0 %v1056_v17  ;;  %935 = vmatprep.subr.bf16.mxu1 %v1238_v0 }
  0x81   : > { %896 = vmatpush3.bf16.msra.mxu0 %v1057_v18  ;;  %936 = vmatpush3.bf16.msra.mxu1 %v1058_v20 }
  0x82   : > { %897 = vmatprep.subr.bf16.mxu0 %v1059_v21  ;;  %937 = vmatprep.subr.bf16.mxu1 %v1238_v0 }
  0x85   : > { %898 = vmatpush3.bf16.msra.mxu0 %v1060_v22  ;;  %938 = vmatpush3.bf16.msra.mxu1 %v1061_v23 }
  0x86   : > { %899 = vmatprep.subr.bf16.mxu0 %v1062_v24  ;;  %939 = vmatprep.subr.bf16.mxu1 %v1238_v0 }
  0x89   : > { %900 = vmatpush3.bf16.msra.mxu0 %v1063_v34  ;;  %940 = vmatpush3.bf16.msra.mxu1 %v1064_v37 }
  0x8a   : > { %945 = vmatprep.subr.bf16.mxu0 %v1238_v0 }
  0x8c   : > { %862 = vmatmul.mubr.msk.bf16.vlgmr.msra.gmra.mrb[0].mxu0 %vm1474_vm5, %v861_v40  ;;  %942 = vmatmul.mubr.msk.bf16.vlgmr.msra.gmra.mrb[0].mxu1 %vm864_vm7, %v865_v41 }
  0x8d   : > { %946 = vmatpush3.bf16.msra.mxu0 %v1065_v42  ;;  %961 = vmatprep.mubr.msk.bf16.mxu0 %vm1239_vm0, %v1238_v0 }
  0x8e   : > { %947 = vmatprep.subr.bf16.mxu0 %v1238_v0 }
  0x91   : > { %948 = vmatpush3.bf16.msra.mxu0 %v1066_v43 }
  0x92   : > { %949 = vmatprep.subr.bf16.mxu0 %v1238_v0 }
  0x95   : > { %950 = vmatpush3.bf16.msra.mxu0 %v1067_v44 }
  0x96   : > { %951 = vmatprep.subr.bf16.mxu0 %v1238_v0 }
  0x99   : > { %952 = vmatpush3.bf16.msra.mxu0 %v1068_v45 }
  0x9a   : > { %953 = vmatprep.subr.bf16.mxu0 %v1238_v0 }
  0x9d   : > { %954 = vmatpush3.bf16.msra.mxu0 %v1069_v46 }
  0x9e   : > { %955 = vmatprep.subr.bf16.mxu0 %v1238_v0 }
  0xa1   : > { %956 = vmatpush3.bf16.msra.mxu0 %v1070_v47 }
  0xa2   : > { %957 = vmatprep.subr.bf16.mxu0 %v1238_v0 }
  0xa5   : > { %958 = vmatpush3.bf16.msra.mxu0 %v1071_v48 }
  0xa6   : > { %959 = vmatprep.subr.bf16.mxu0 %v1238_v0 }
  0xa9   : > { %960 = vmatpush3.bf16.msra.mxu0 %v1072_v49 }
 0x15f   : > { %v901_v50 = vpop.f32.mrb[0].mxu0  ;;  %v575_v53 = vpop.f32.mrb[0].mxu1 }
 0x160   : > { %v902_v51 = vpop.f32.mrb[1].mxu0  ;;  %v943_v56 = vpop.f32.mrb[1].mxu1 }
 0x161   : > { %v903_v54 = vadd.f32 %v902_v51, %v901_v50  ;;  %v904_v55 = vpop.f32.mrb[2].mxu0  ;;  %v578_v58 = vpop.f32.mrb[2].mxu1 }
 0x162   : > { %v905_v57 = vpop.f32.mrb[3].mxu0  ;;  %v944_v61 = vpop.f32.mrb[3].mxu1 }
 0x163   : > { %v535_v59 = vadd.f32 %v903_v54, %v834_v52  ;;  %v906_v60 = vadd.f32 %v905_v57, %v904_v55 }
 0x165   : > { %v576_v62 = vadd.f32 %v575_v53, %v535_v59  ;;  %v538_v63 = vadd.f32 %v906_v60, %v834_v52 }
 0x167   : > { %v582_v0 = vadd.f32 3.0, %v576_v62  ;;  %v579_v1 = vadd.f32 %v578_v58, %v538_v63 }
 0x169   : > { %v584_v2 = vmax.f32 %v582_v0, 0.0  ;;  %v583_v3 = vadd.f32 3.0, %v579_v1 }
 0x16b   : > { %v586_v4 = vmin.f32 %v584_v2, 6.0  ;;  %v585_v5 = vmax.f32 %v583_v3, 0.0 }
 0x16d   : > { %v587_v6 = vmin.f32 %v585_v5, 6.0  ;;  %v588_v7 = vmul.f32 %v586_v4, %v576_v62 }
 0x16f   : > { %v589_v8 = vmul.f32 %v587_v6, %v579_v1 }
 0x171   : > { %v590_v9 = vpack.c.bf16 %v589_v8, %v588_v7 }
 0x173   : > { %962 = vmatmul.mubr.bf16.vlgmr.msra.gmra.mrb[4].mxu0 %v590_v9 }
 0x246   : > { %v696_v11 = vpop.f32.mrb[4].mxu0 }
 0x247   : > { %v697_v12 = vadd.f32 %v867_v10, %v696_v11  ;;  %v963_v13 = vpop.f32.mrb[5].mxu0 }
 0x248   : > { %v699_v14 = vpop.f32.mrb[6].mxu0 }
 0x249   : > { %v703_v15 = vadd.f32 3.0, %v697_v12  ;;  %v700_v16 = vadd.f32 %v867_v10, %v699_v14  ;;  %v964_v17 = vpop.f32.mrb[7].mxu0 }
 0x24b   : > { %v705_v18 = vmax.f32 %v703_v15, 0.0  ;;  %v704_v19 = vadd.f32 3.0, %v700_v16 }
 0x24d   : > { %v707_v20 = vmin.f32 %v705_v18, 6.0  ;;  %v706_v21 = vmax.f32 %v704_v19, 0.0 }
 0x24f   : > { %v709_v22 = vmul.f32 %v707_v20, %v697_v12  ;;  %v708_v23 = vmin.f32 %v706_v21, 6.0 }
 0x251   : > { %v711_v24 = vmul.f32 0.16666667, %v709_v22  ;;  %v710_v25 = vmul.f32 %v708_v23, %v700_v16 }
 0x253   : > { %713 = vst [vmem:[%s271_s11] sm:$0xff] %v711_v24  ;;  %v712_v26 = vmul.f32 0.16666667, %v710_v25 }
 0x255   : > { %714 = vst [vmem:[%s271_s11 + $0x8] sm:$0xff] %v712_v26 }
 0x256   : > { %1172 = shalt.err (!%p1169_p2)
}
 0x257   : > { %s1173_s6 = scalar_lea.hbm %s1508_s9, 256  ;;  %s1177_s8 = scalar_lea.hbm %s1557_s5, 512 }
 0x258   : > { %p1174_p13 = scmp.ne.s32.totalorder %s1508_s9, %s1173_s6  ;;  %p1178_p4 = scmp.lt.u32.totalorder %s1508_s9, %s1557_s5 }
 0x259   : > { %p1179_p5 = scmp.lt.u32.totalorder %s1177_s8, %s1173_s6  ;;  %p1181_p11 = scmp.lt.u32.totalorder %s1173_s6, %s1508_s9 }
 0x25a   : > { %p1175_p6 = pnand %p1174_p13, %p1573_p0 }
 0x25b   : > { %p1180_p8 = por %p1179_p5, %p1178_p4 }
 0x25c   : > { %p1176_p10 = pneg %p1175_p6 }
 0x25d   : > { %p1182_p1 = por %p1181_p11, %p1180_p8 }
 0x25f   : > { %p1183_p3 = pnand %p1182_p1, %p1176_p10 }
 0x261   : > { %1186 = shalt.err (!%p1183_p3)
}
 0x262   : > { %s1242_s30 = smov 128   ;;  %s1243_s15 = smov 8  }
 0x263   : > { %975 = dma.vmem_to_hbm [thread:$0]  (%p1573_p0), %s1503_s28, 256, %s1508_s9, %s716_s12, %s1242_s30, %s1242_s30, %s1243_s15  }
 0x264 PF: > { %s744_s16 = sand.u32 1, %s1217_s18   ;;  %p1574_p7 = scmp.ne.s32.totalorder %s1562_s25, 0 }
 0x265   : > { %p1575_p9 = scmp.ge.s32.totalorder %s1229_s21, 2  ;;  %s745_s13 = scalar_lea.sflag [#allocation4], %s744_s16 }
 0x267   : > { %p989_p12 = pnand %p1575_p9, %p1574_p7 }
 0x269   : > { %1212 = dma.done.wait (!%p989_p12), %s745_s13, 256  }
 0x26a   : > { %1214 = vsyncadd (!%p989_p12), %s745_s13, 4294967040  ;;  %p19_p2 = scmp.ge.s32.totalorder %s1384_s14, 4   ;;  %s1576_s18 = smov %s1221_s19 }
 0x26b   : > { %s1577_s19 = smov %s1225_s20  ;;  %s1578_s20 = smov %s1400_s27 }
 0x26c   : > { %s1579_s21 = smov %s1384_s14  ;;  %21 = sbr.rel (!%p19_p2) target bundleno = 6 (0x6), region = 93 }
 0x273   :  { %750 = vsyncpa [#allocation3], 1 }
 0x274   :  { %752 = vsyncpa [#allocation3 + $0x1], 1 }
 0x275   :  { %753 = vsyncpa [#allocation6], 1 }
 0x276   :  { %754 = vsyncpa [#allocation4], 1 }
 0x277   :  { %756 = vsyncpa [#allocation4 + $0x1], 1 }

</bundles_post_ra>
